<compile_context>
chip_gen: v6e
topology: v6e:2x2x1
jax: 0.10.0
libtpu: 0.0.40
codegen_flags: <defaults>
</compile_context>

<pallas_src>
import functools

import jax
import jax.numpy as jnp
from jax.experimental import pallas as pl
from jax.experimental.pallas import tpu as pltpu


def _rpn_kernel(x_ref, w1_ref, b1_ref, wh_ref, bh_ref, out_ref, *, n_rows, w_pad):
    # x_ref:   (1, 1, n_rows + 2*w_pad, 3*Cin)  padded rows [t*th, t*th + th + 2)
    #          of the W-im2col'd image, flattened row-major over (row, col).
    # w1_ref:  (3, 3*Cin, 256)  conv1 weight, one K-slab per vertical tap.
    # b1_ref:  (1, 256)
    # wh_ref:  (256, 64)        fused cls|box head, zero-padded to 64 lanes.
    # bh_ref:  (1, 64)
    # out_ref: (1, n_rows, 64)

    # 3x3 conv == 3 vertical-tap matmuls (K = 3*Cin), f32 accumulation on MXU.
    # Tap dy reads the tile shifted down by dy rows (dy * w_pad flat positions);
    # all slice starts are multiples of 8 -> sublane-aligned loads, no relayout.
    h = jnp.dot(x_ref[0, 0, 0:n_rows, :], w1_ref[0],
                preferred_element_type=jnp.float32)
    h = h + jnp.dot(x_ref[0, 0, w_pad:w_pad + n_rows, :], w1_ref[1],
                    preferred_element_type=jnp.float32)
    h = h + jnp.dot(x_ref[0, 0, 2 * w_pad:2 * w_pad + n_rows, :], w1_ref[2],
                    preferred_element_type=jnp.float32)
    h = jnp.maximum(h + b1_ref[...], 0.0)                     # bias + ReLU (VPU)

    # Fused 1x1 heads: one [256, 64] matmul (18 cls + 36 box + 10 zero pad).
    y = jnp.dot(h, wh_ref[...], preferred_element_type=jnp.float32) + bh_ref[...]
    out_ref[0] = y.astype(out_ref.dtype)


def rpn_forward(x_nchw, params, *, tile_h=None):
    """x_nchw: [B, Cin, H, W] float32 -> (cls [B,18,H,W], box [B,36,H,W])."""
    w1, b1, wc, bc, wb, bb = params
    B, Cin, H, W = x_nchw.shape
    C_MID, C_CLS, C_BOX = 256, 18, 36
    C_HEAD = 64                                   # 18 + 36 = 54, padded to 64 lanes

    W_pad = ((W + 7) // 8) * 8                    # 8-aligned row stride (sublanes)
    if tile_h is None:
        # Largest divisor of H whose per-tile working set (input + hidden + out)
        # stays well under VMEM.
        budget = 6 << 20
        tile_h = 1
        for cand in range(H, 0, -1):
            if H % cand == 0 and cand * W_pad * (3 * Cin + C_MID + C_HEAD) * 4 <= budget:
                tile_h = cand
                break
    assert H % tile_h == 0, "tile_h must divide H"
    T = H // tile_h
    n_rows = tile_h * W_pad
    rows_in = (tile_h + 2) * W_pad

    # ---- glue: NCHW -> NHWC, conv pad + lane pad, W-direction im2col (3x) ----
    x = jnp.transpose(x_nchw, (0, 2, 3, 1))                               # [B,H,W,Cin]
    xp = jnp.pad(x, ((0, 0), (1, 1), (1, 1 + W_pad - W), (0, 0)))         # [B,H+2,Wp+2,Cin]
    xw = jnp.concatenate([xp[:, :, dx:dx + W_pad, :] for dx in range(3)],
                         axis=-1)                                         # [B,H+2,Wp,3Cin]
    # Overlapping row tiles: each tile carries its 2 halo rows, flattened so the
    # kernel's vertical-tap slices are plain sublane-aligned static slices.
    tiles = jnp.stack(
        [xw[:, t * tile_h:t * tile_h + tile_h + 2] for t in range(T)],
        axis=1)                                                           # [B,T,th+2,Wp,3Cin]
    tiles = tiles.reshape(B, T, rows_in, 3 * Cin)

    # ---- weights: conv1 per vertical tap, fused + lane-padded heads ----
    w1_s = w1.reshape(3, 3 * Cin, C_MID)                                  # [kh, kw*Cin, 256]
    b1_2 = b1.reshape(1, C_MID)
    pad_n = C_HEAD - C_CLS - C_BOX
    wh = jnp.pad(jnp.concatenate([wc, wb], axis=1), ((0, 0), (0, pad_n)))
    bh = jnp.pad(jnp.concatenate([bc, bb]), (0, pad_n)).reshape(1, C_HEAD)

    flops = 2 * B * H * W_pad * (3 * (3 * Cin) * C_MID + C_MID * C_HEAD)
    bytes_accessed = 4 * (tiles.size + w1_s.size + b1_2.size + wh.size + bh.size
                          + B * H * W_pad * C_HEAD)
    cost = pl.CostEstimate(flops=flops, transcendentals=0,
                           bytes_accessed=bytes_accessed)

    kernel = functools.partial(_rpn_kernel, n_rows=n_rows, w_pad=W_pad)
    out = pl.pallas_call(
        kernel,
        out_shape=jax.ShapeDtypeStruct((B, H * W_pad, C_HEAD), x_nchw.dtype),
        grid=(B, T),
        in_specs=[
            pl.BlockSpec((1, 1, rows_in, 3 * Cin), lambda b, t: (b, t, 0, 0)),
            pl.BlockSpec((3, 3 * Cin, C_MID),      lambda b, t: (0, 0, 0)),
            pl.BlockSpec((1, C_MID),               lambda b, t: (0, 0)),
            pl.BlockSpec((C_MID, C_HEAD),          lambda b, t: (0, 0)),
            pl.BlockSpec((1, C_HEAD),              lambda b, t: (0, 0)),
        ],
        out_specs=pl.BlockSpec((1, n_rows, C_HEAD), lambda b, t: (b, t, 0)),
        compiler_params=pltpu.CompilerParams(
            dimension_semantics=("parallel", "parallel"),
            vmem_limit_bytes=48 * 1024 * 1024),
        cost_estimate=cost,
    )(tiles, w1_s, b1_2, wh, bh)

    # ---- glue: drop lane padding, split heads, back to NCHW ----
    y = out.reshape(B, H, W_pad, C_HEAD)[:, :, :W, :]
    cls = jnp.transpose(y[..., :C_CLS], (0, 3, 1, 2))
    box = jnp.transpose(y[..., C_CLS:C_CLS + C_BOX], (0, 3, 1, 2))
    return cls, box


def rpn_reference(x_nchw, params):
    """Pure-JAX reference (lax.conv) for correctness checking."""
    w1, b1, wc, bc, wb, bb = params
    x = jnp.transpose(x_nchw, (0, 2, 3, 1))
    h = jax.lax.conv_general_dilated(
        x, w1, window_strides=(1, 1), padding="SAME",
        dimension_numbers=("NHWC", "HWIO", "NHWC"),
        precision=jax.lax.Precision.HIGHEST) + b1
    h = jnp.maximum(h, 0.0)
    cls = jnp.einsum("bhwc,ck->bhwk", h, wc,
                     precision=jax.lax.Precision.HIGHEST) + bc
    box = jnp.einsum("bhwc,ck->bhwk", h, wb,
                     precision=jax.lax.Precision.HIGHEST) + bb
    return jnp.transpose(cls, (0, 3, 1, 2)), jnp.transpose(box, (0, 3, 1, 2))


def init_params(key, in_channels):
    k1, k2, k3, k4, k5, k6 = jax.random.split(key, 6)
    w1 = jax.random.normal(k1, (3, 3, in_channels, 256), jnp.float32) * 0.05
    b1 = jax.random.normal(k2, (256,), jnp.float32) * 0.05
    wc = jax.random.normal(k3, (256, 18), jnp.float32) * 0.05
    bc = jax.random.normal(k4, (18,), jnp.float32) * 0.05
    wb = jax.random.normal(k5, (256, 36), jnp.float32) * 0.05
    bb = jax.random.normal(k6, (36,), jnp.float32) * 0.05
    return (w1, b1, wc, bc, wb, bb)


if __name__ == "__main__":
    key = jax.random.PRNGKey(0)
    kx, kp = jax.random.split(key)

    B, Cin, H, W = 2, 4, 16, 16
    x = jax.random.normal(kx, (B, Cin, H, W), jnp.float32)
    params = init_params(kp, Cin)

    # tile_h=8 -> grid (2, 2): exercises the row-tiling + halo path.
    fwd = jax.jit(functools.partial(rpn_forward, tile_h=8))
    cls, box = fwd(x, params)
    jax.block_until_ready((cls, box))

    cls_ref, box_ref = rpn_reference(x, params)
    assert cls.shape == (B, 18, H, W) and box.shape == (B, 36, H, W)
    # Tolerance covers possible bf16-pass differences between MXU and XLA conv.
    assert jnp.allclose(cls, cls_ref, atol=2e-3, rtol=2e-2), \
        float(jnp.max(jnp.abs(cls - cls_ref)))
    assert jnp.allclose(box, box_ref, atol=2e-3, rtol=2e-2), \
        float(jnp.max(jnp.abs(box - box_ref)))

    print("KERNEL_OK")
</pallas_src>

<mosaic_0001>
module attributes {stable_mosaic.version = 11 : i64} {
  func.func @_rpn_kernel(%arg0: i32, %arg1: i32, %arg2: memref<1x1x160x12xf32, #tpu.memory_space<vmem>>, %arg3: memref<3x12x256xf32, #tpu.memory_space<vmem>>, %arg4: memref<1x256xf32, #tpu.memory_space<vmem>>, %arg5: memref<256x64xf32, #tpu.memory_space<vmem>>, %arg6: memref<1x64xf32, #tpu.memory_space<vmem>>, %arg7: memref<1x128x64xf32, #tpu.memory_space<vmem>>) attributes {dimension_semantics = [#tpu.dimension_semantics<parallel>, #tpu.dimension_semantics<parallel>], iteration_bounds = array<i64: 2, 2>, scalar_prefetch = 0 : i64, scratch_operands = 0 : i64, tpu.core_type = #tpu.core_type<tc>, window_params = [{transform_indices = @transform_0, window_bounds = array<i64: 1, 1, 160, 12>}, {pipeline_mode = #tpu.pipeline_mode<synchronous>, transform_indices = @transform_1, window_bounds = array<i64: 3, 12, 256>}, {pipeline_mode = #tpu.pipeline_mode<synchronous>, transform_indices = @transform_2, window_bounds = array<i64: 1, 256>}, {pipeline_mode = #tpu.pipeline_mode<synchronous>, transform_indices = @transform_3, window_bounds = array<i64: 256, 64>}, {pipeline_mode = #tpu.pipeline_mode<synchronous>, transform_indices = @transform_4, window_bounds = array<i64: 1, 64>}, {transform_indices = @transform_5, window_bounds = array<i64: 1, 128, 64>}]} {
    %c0 = arith.constant 0 : index
    %c0_0 = arith.constant 0 : index
    %c0_1 = arith.constant 0 : index
    %c0_2 = arith.constant 0 : index
    %0 = vector.load %arg2[%c0, %c0_0, %c0_1, %c0_2] : memref<1x1x160x12xf32, #tpu.memory_space<vmem>>, vector<1x1x128x12xf32>
    %1 = vector.shape_cast %0 : vector<1x1x128x12xf32> to vector<128x12xf32>
    %c0_3 = arith.constant 0 : index
    %c0_4 = arith.constant 0 : index
    %c0_5 = arith.constant 0 : index
    %2 = vector.load %arg3[%c0_3, %c0_4, %c0_5] : memref<3x12x256xf32, #tpu.memory_space<vmem>>, vector<1x12x256xf32>
    %3 = vector.shape_cast %2 : vector<1x12x256xf32> to vector<12x256xf32>
    %cst = arith.constant dense<0.000000e+00> : vector<128x256xf32>
    %4 = tpu.matmul %1, %3, %cst {dimension_numbers = #tpu.dot_dimension_numbers<[1], [0], [0], [1], [0, 0, 1, 1], [], []>} : vector<128x12xf32>, vector<12x256xf32>, vector<128x256xf32> -> vector<128x256xf32>
    %c0_6 = arith.constant 0 : index
    %c0_7 = arith.constant 0 : index
    %c16 = arith.constant 16 : index
    %c0_8 = arith.constant 0 : index
    %5 = vector.load %arg2[%c0_6, %c0_7, %c16, %c0_8] : memref<1x1x160x12xf32, #tpu.memory_space<vmem>>, vector<1x1x128x12xf32>
    %6 = vector.shape_cast %5 : vector<1x1x128x12xf32> to vector<128x12xf32>
    %c1 = arith.constant 1 : index
    %c0_9 = arith.constant 0 : index
    %c0_10 = arith.constant 0 : index
    %7 = vector.load %arg3[%c1, %c0_9, %c0_10] : memref<3x12x256xf32, #tpu.memory_space<vmem>>, vector<1x12x256xf32>
    %8 = vector.shape_cast %7 : vector<1x12x256xf32> to vector<12x256xf32>
    %cst_11 = arith.constant dense<0.000000e+00> : vector<128x256xf32>
    %9 = tpu.matmul %6, %8, %cst_11 {dimension_numbers = #tpu.dot_dimension_numbers<[1], [0], [0], [1], [0, 0, 1, 1], [], []>} : vector<128x12xf32>, vector<12x256xf32>, vector<128x256xf32> -> vector<128x256xf32>
    %10 = arith.addf %4, %9 : vector<128x256xf32>
    %c0_12 = arith.constant 0 : index
    %c0_13 = arith.constant 0 : index
    %c32 = arith.constant 32 : index
    %c0_14 = arith.constant 0 : index
    %11 = vector.load %arg2[%c0_12, %c0_13, %c32, %c0_14] : memref<1x1x160x12xf32, #tpu.memory_space<vmem>>, vector<1x1x128x12xf32>
    %12 = vector.shape_cast %11 : vector<1x1x128x12xf32> to vector<128x12xf32>
    %c2 = arith.constant 2 : index
    %c0_15 = arith.constant 0 : index
    %c0_16 = arith.constant 0 : index
    %13 = vector.load %arg3[%c2, %c0_15, %c0_16] : memref<3x12x256xf32, #tpu.memory_space<vmem>>, vector<1x12x256xf32>
    %14 = vector.shape_cast %13 : vector<1x12x256xf32> to vector<12x256xf32>
    %cst_17 = arith.constant dense<0.000000e+00> : vector<128x256xf32>
    %15 = tpu.matmul %12, %14, %cst_17 {dimension_numbers = #tpu.dot_dimension_numbers<[1], [0], [0], [1], [0, 0, 1, 1], [], []>} : vector<128x12xf32>, vector<12x256xf32>, vector<128x256xf32> -> vector<128x256xf32>
    %16 = arith.addf %10, %15 : vector<128x256xf32>
    %c0_18 = arith.constant 0 : index
    %c0_19 = arith.constant 0 : index
    %17 = vector.load %arg4[%c0_18, %c0_19] : memref<1x256xf32, #tpu.memory_space<vmem>>, vector<1x256xf32>
    %18 = vector.broadcast %17 : vector<1x256xf32> to vector<128x256xf32>
    %19 = arith.addf %16, %18 : vector<128x256xf32>
    %cst_20 = arith.constant 0.000000e+00 : f32
    %20 = vector.broadcast %cst_20 : f32 to vector<128x256xf32>
    %21 = arith.maximumf %19, %20 : vector<128x256xf32>
    %c0_21 = arith.constant 0 : index
    %c0_22 = arith.constant 0 : index
    %22 = vector.load %arg5[%c0_21, %c0_22] : memref<256x64xf32, #tpu.memory_space<vmem>>, vector<256x64xf32>
    %cst_23 = arith.constant dense<0.000000e+00> : vector<128x64xf32>
    %23 = tpu.matmul %21, %22, %cst_23 {dimension_numbers = #tpu.dot_dimension_numbers<[1], [0], [0], [1], [0, 0, 1, 1], [], []>} : vector<128x256xf32>, vector<256x64xf32>, vector<128x64xf32> -> vector<128x64xf32>
    %c0_24 = arith.constant 0 : index
    %c0_25 = arith.constant 0 : index
    %24 = vector.load %arg6[%c0_24, %c0_25] : memref<1x64xf32, #tpu.memory_space<vmem>>, vector<1x64xf32>
    %25 = vector.broadcast %24 : vector<1x64xf32> to vector<128x64xf32>
    %26 = arith.addf %23, %25 : vector<128x64xf32>
    %c0_26 = arith.constant 0 : index
    %c0_27 = arith.constant 0 : index
    %c0_28 = arith.constant 0 : index
    %27 = vector.load %arg7[%c0_26, %c0_27, %c0_28] : memref<1x128x64xf32, #tpu.memory_space<vmem>>, vector<1x128x64xf32>
    %28 = vector.shape_cast %27 : vector<1x128x64xf32> to vector<128x64xf32>
    %29 = vector.shape_cast %26 : vector<128x64xf32> to vector<1x128x64xf32>
    tpu.vector_store %arg7[%c0_26, %c0_27, %c0_28], %29 {strides = array<i32>} : memref<1x128x64xf32, #tpu.memory_space<vmem>>, vector<1x128x64xf32>,
    return
  }
  func.func @transform_0(%arg0: i32, %arg1: i32) -> (i32, i32, i32, i32) {
    %c0_i32 = arith.constant 0 : i32
    %c0_i32_0 = arith.constant 0 : i32
    %c0_i32_1 = arith.constant 0 : i32
    return %arg0, %arg1, %c0_i32, %c0_i32_0 : i32, i32, i32, i32
  }
  func.func @transform_1(%arg0: i32, %arg1: i32) -> (i32, i32, i32) {
    %c0_i32 = arith.constant 0 : i32
    %c0_i32_0 = arith.constant 0 : i32
    %c0_i32_1 = arith.constant 0 : i32
    %c0_i32_2 = arith.constant 0 : i32
    return %c0_i32, %c0_i32_0, %c0_i32_1 : i32, i32, i32
  }
  func.func @transform_2(%arg0: i32, %arg1: i32) -> (i32, i32) {
    %c0_i32 = arith.constant 0 : i32
    %c0_i32_0 = arith.constant 0 : i32
    %c0_i32_1 = arith.constant 0 : i32
    return %c0_i32, %c0_i32_0 : i32, i32
  }
  func.func @transform_3(%arg0: i32, %arg1: i32) -> (i32, i32) {
    %c0_i32 = arith.constant 0 : i32
    %c0_i32_0 = arith.constant 0 : i32
    %c0_i32_1 = arith.constant 0 : i32
    return %c0_i32, %c0_i32_0 : i32, i32
  }
  func.func @transform_4(%arg0: i32, %arg1: i32) -> (i32, i32) {
    %c0_i32 = arith.constant 0 : i32
    %c0_i32_0 = arith.constant 0 : i32
    %c0_i32_1 = arith.constant 0 : i32
    return %c0_i32, %c0_i32_0 : i32, i32
  }
  func.func @transform_5(%arg0: i32, %arg1: i32) -> (i32, i32, i32) {
    %c0_i32 = arith.constant 0 : i32
    %c0_i32_0 = arith.constant 0 : i32
    return %arg0, %arg1, %c0_i32 : i32, i32, i32
  }
}

</mosaic_0001>

<bundles_post_ra>
// kernel: rpn_forward.1
= control target key start
LH: loop header
LB: loop body
LE: loop exit
PB: predicated region body
PF: predicated region fallthrough
CT: control target
= control target key end

     0   :  { %s1585_s18 = smov 0   ;;  %s1587_s19 = smov 0   ;;  %s2205_s0 = inlined_call_operand.vmem [shape: f32[2,2,160,12], index: 0, kind: input, shape index: {}]   ;;  %s2206_s1 = inlined_call_operand.vmem [shape: f32[3,12,256], index: 1, kind: input, shape index: {}]   ;;  %s2207_s2 = inlined_call_operand.vmem [shape: f32[1,256], index: 2, kind: input, shape index: {}]   ;;  %s2208_s3 = inlined_call_operand.vmem [shape: f32[256,64], index: 3, kind: input, shape index: {}]   ;;  %s2209_s4 = inlined_call_operand.vmem [shape: f32[1,64], index: 4, kind: input, shape index: {}]   ;;  %s2210_s5 = inlined_call_operand.vmem [shape: f32[2,256,64], index: 5, kind: output, shape index: {}]  }
   0x1   :  { %s1589_s20 = smov 0   ;;  %s1591_s21 = smov 0  }
   0x2   :  { %s1593_s22 = smov 0  }
   0x3 LB: > { %s24_s23 = sadd.s32 1, %s1544_s20  ;;  %s27_s24 = sadd.s32 1, %s1548_s21  ;;  %s1552_s22 = sphi %s1593_s22, %s15_s22   ;;  %s1548_s21 = sphi %s1591_s21, %s2220_s21   ;;  %s1544_s20 = sphi %s1589_s20, %s2219_s20   ;;  %s1540_s19 = sphi %s1587_s19, %s2218_s19   ;;  %s1536_s18 = sphi %s1585_s18, %s2217_s18  }
   0x4   : > { %p25_p0 = scmp.ge.s32.totalorder %s24_s23, 2  ;;  %p1321_p1 = scmp.ge.s32.totalorder %s1552_s22, 1 }
   0x5   : > { %p207_p2 = scmp.lt.s32.totalorder %s1552_s22, 5 }
   0x6   : > { %s2222_s23 = smov (%p25_p0, %s24_s23), 0  ;;  %s2224_s24 = smov (!%p25_p0, %s27_s24), %s1548_s21 }
   0x7   : > { %p208_p3 = pnand %p1321_p1, %p207_p2  ;;  %p29_p4 = scmp.ge.s32.totalorder %s2224_s24, 2 }
   0x9   : > { %s2226_s24 = smov (%p29_p4, %s2224_s24), 0  ;;  %211 = sbr.rel (%p208_p3) target bundleno = 552 (0x228), region = 40 }
   0xe   : > { %v1329_v0 = vld [vmem:[%s2206_s1 + $0x38] sm:$0xf]  ;;  %vm338_vm0 = vcmask 1043456   ;;  %v1328_v1 = vld [vmem:[%s2206_s1 + $0x30] sm:$0xf]  ;;  %v1327_v2 = vld [vmem:[%s2206_s1 + $0x28] sm:$0xff] }
   0xf   : > { %1330 = vmatprep.subr.msk.mxu0 %vm338_vm0, %v1329_v0  ;;  %v281_v3 = vld [vmem:[%s2206_s1 + $0x18] sm:$0xf]  ;;  %v280_v4 = vld [vmem:[%s2206_s1 + $0x10] sm:$0xf]  ;;  %v1326_v5 = vld [vmem:[%s2206_s1 + $0x20] sm:$0xff]  ;;  %p243_p5 = scmp.lt.s32.totalorder %s1540_s19, 1 }
  0x10   : > { %1331 = vmatpush1.msk.msra.mxu0 %vm338_vm0, %v1328_v1  ;;  %1348 = vmatprep.subr.msk.mxu1 %vm338_vm0, %v281_v3  ;;  %v279_v6 = vld [vmem:[%s2206_s1 + $0x8] sm:$0xff]  ;;  %v278_v7 = vld [vmem:[%s2206_s1] sm:$0xff]  ;;  %p245_p6 = scmp.lt.s32.totalorder %s1536_s18, 1  ;;  %v1369_v8 = vld [vmem:[%s2206_s1 + $0x58] sm:$0xf]  ;;  %v1554_v9 = vmov 0.0  }
  0x11   : > { %375 = vmatprep.subr.mxu0 %v1327_v2  ;;  %1349 = vmatpush1.msk.msra.mxu1 %vm338_vm0, %v280_v4  ;;  %s2228_s19 = smov (!%p243_p5, %s1540_s19), 1  ;;  %vm289_vm1 = vcmask 97280   ;;  %v1368_v10 = vld [vmem:[%s2206_s1 + $0x50] sm:$0xf]  ;;  %v1367_v13 = vld [vmem:[%s2206_s1 + $0x48] sm:$0xff]  ;;  %v1366_v14 = vld [vmem:[%s2206_s1 + $0x40] sm:$0xff] }
  0x12   : > { %376 = vmatpush1.msra.mxu0 %v1326_v5  ;;  %548 = vmatprep.subr.mxu1 %v279_v6  ;;  %s246_s25 = scalar_select %p245_p6, %s1536_s18, 1  ;;  %v1054_v31 = vld [vmem:[%s2208_s3 + $0xf8] sm:$0xff]  ;;  %v1053_v33 = vld [vmem:[%s2208_s3 + $0xf0] sm:$0xff]  ;;  %v1052_v35 = vld [vmem:[%s2208_s3 + $0xe8] sm:$0xff]  ;;  %vm1207_vm2 = vcmask 523264  }
  0x13   : > { %409 = vmatprep.mubr.f32.mxu0 %v1554_v9  ;;  %549 = vmatpush1.msra.mxu1 %v278_v7  ;;  %s1472_s26 = smul.u32 40, %s2228_s19  ;;  %v1038_v32 = vld [vmem:[%s2208_s3 + $0x78] sm:$0xff]  ;;  %v1037_v34 = vld [vmem:[%s2208_s3 + $0x70] sm:$0xff]  ;;  %v1036_v36 = vld [vmem:[%s2208_s3 + $0x68] sm:$0xff]  ;;  %s1323_s11 = sshll.u32 %s1536_s18, 4 }
  0x14   : > { %582 = vmatprep.mubr.f32.mxu1 %v1554_v9  ;;  %1370 = vmatprep.subr.msk.mxu0 %vm338_vm0, %v1369_v8  ;;  %s1471_s27 = smul.u32 20, %s246_s25  ;;  %v1051_v37 = vld [vmem:[%s2208_s3 + $0xe0] sm:$0xff]  ;;  %v1050_v39 = vld [vmem:[%s2208_s3 + $0xd8] sm:$0xff]  ;;  %v1049_v41 = vld [vmem:[%s2208_s3 + $0xd0] sm:$0xff]  ;;  %p255_p7 = scmp.lt.s32.totalorder %s1323_s11, 31 }
  0x15   : > { %1391 = vmatprep.subr.mxu1 %v1054_v31  ;;  %v1035_v38 = vld [vmem:[%s2208_s3 + $0x60] sm:$0xff]  ;;  %v1034_v40 = vld [vmem:[%s2208_s3 + $0x58] sm:$0xff]  ;;  %v1033_v42 = vld [vmem:[%s2208_s3 + $0x50] sm:$0xff]  ;;  %s1324_s12 = sshll.u32 %s2228_s19, 5 }
  0x16   : > { %s249_s28 = sadd.s32 %s1472_s26, %s1471_s27  ;;  %v1048_v43 = vld [vmem:[%s2208_s3 + $0xc8] sm:$0xff]  ;;  %v1047_v45 = vld [vmem:[%s2208_s3 + $0xc0] sm:$0xff]  ;;  %v1046_v47 = vld [vmem:[%s2208_s3 + $0xb8] sm:$0xff]  ;;  %s2230_s11 = smov (!%p255_p7, %s1323_s11), 31 }
  0x17   : > { %s1322_s29 = sshll.u32 %s249_s28, 3  ;;  %v1032_v44 = vld [vmem:[%s2208_s3 + $0x48] sm:$0xff]  ;;  %v1031_v46 = vld [vmem:[%s2208_s3 + $0x40] sm:$0xff]  ;;  %v1030_v48 = vld [vmem:[%s2208_s3 + $0x38] sm:$0xff]  ;;  %s258_s13 = sadd.s32 %s1324_s12, %s2230_s11 }
  0x18   : > { %s1663_s7 = scalar_lea.vmem %s2205_s0, %s1322_s29  ;;  %v1045_v49 = vld [vmem:[%s2208_s3 + $0xb0] sm:$0xff]  ;;  %v1044_v51 = vld [vmem:[%s2208_s3 + $0xa8] sm:$0xff]  ;;  %v1043_v54 = vld [vmem:[%s2208_s3 + $0xa0] sm:$0xff]  ;;  %s1325_s14 = sshll.u32 %s258_s13, 3 }
  0x19   : > { %v264_v11 = vld [vmem:[%s1663_s7 + $0x10] sm:$0xff]  ;;  %v262_v12 = vld [vmem:[%s1663_s7] sm:$0xff]  ;;  %v265_v15 = vld [vmem:[%s1663_s7 + $0x18] sm:$0xff] }
  0x1a   : > { %1332 = vmatmul.mubr.msk.f32.vlgmr.msra.gmra.mxu0 %vm289_vm1, %v264_v11  ;;  %1350 = vmatmul.mubr.msk.f32.vlgmr.msra.gmra.mxu1 %vm289_vm1, %v262_v12  ;;  %v263_v16 = vld [vmem:[%s1663_s7 + $0x8] sm:$0xff]  ;;  %v1688_v17 = vld [vmem:[%s1663_s7 + $0x20] sm:$0xff]  ;;  %v1704_v19 = vld [vmem:[%s1663_s7 + $0x30] sm:$0xff] }
  0x1b   : > { %1371 = vmatpush1.msk.msra.mxu0 %vm338_vm0, %v1368_v10  ;;  %415 = vmatprep.mubr.f32.mxu0 %v1554_v9  ;;  %v1696_v18 = vld [vmem:[%s1663_s7 + $0x28] sm:$0xff]  ;;  %v1713_v20 = vld [vmem:[%s1663_s7 + $0x38] sm:$0xff]  ;;  %v1722_v21 = vld [vmem:[%s1663_s7 + $0x40] sm:$0xff] }
  0x1c   : > { %588 = vmatprep.mubr.f32.mxu1 %v1554_v9  ;;  %784 = vmatprep.subr.mxu0 %v1367_v13  ;;  %v1731_v22 = vld [vmem:[%s1663_s7 + $0x48] sm:$0xff]  ;;  %v1740_v23 = vld [vmem:[%s1663_s7 + $0x50] sm:$0xff]  ;;  %v1749_v24 = vld [vmem:[%s1663_s7 + $0x58] sm:$0xff] }
  0x1d   : > { %785 = vmatpush1.msra.mxu0 %v1366_v14  ;;  %v1758_v25 = vld [vmem:[%s1663_s7 + $0x60] sm:$0xff]  ;;  %v1767_v26 = vld [vmem:[%s1663_s7 + $0x68] sm:$0xff]  ;;  %v1776_v27 = vld [vmem:[%s1663_s7 + $0x70] sm:$0xff]  ;;  %1392 = vmatpush3.msra.mxu1 %v1038_v32 }
  0x1e   : > { %1333 = vmatmul.mubr.msk.f32.gmra.mxu0 %vm289_vm1, %v265_v15  ;;  %1351 = vmatmul.mubr.msk.f32.gmra.mxu1 %vm289_vm1, %v263_v16  ;;  %v1785_v28 = vld [vmem:[%s1663_s7 + $0x78] sm:$0xff]  ;;  %v1794_v29 = vld [vmem:[%s1663_s7 + $0x80] sm:$0xff]  ;;  %v1803_v30 = vld [vmem:[%s1663_s7 + $0x88] sm:$0xff] }
  0x1f   : > { %421 = vmatprep.mubr.f32.mxu0 %v1554_v9  ;;  %594 = vmatprep.mubr.f32.mxu1 %v1554_v9  ;;  %v1029_v50 = vld [vmem:[%s2208_s3 + $0x30] sm:$0xff]  ;;  %v1028_v52 = vld [vmem:[%s2208_s3 + $0x28] sm:$0xff]  ;;  %v1027_v55 = vld [vmem:[%s2208_s3 + $0x20] sm:$0xff] }
  0x20   : > { %1393 = vmatprep.subr.mxu1 %v1053_v33  ;;  %v693_v53 = vld [vmem:[%s1663_s7 + $0x90] sm:$0xff]  ;;  %v694_v56 = vld [vmem:[%s1663_s7 + $0x98] sm:$0xff]  ;;  %v1040_v61 = vld [vmem:[%s2208_s3 + $0x88] sm:$0xff]  ;;  %s2140_s7 = scalar_lea.vmem %s2210_s5, %s1325_s14 }
  0x21   : > { %1394 = vmatpush3.msra.mxu1 %v1037_v34  ;;  %v1042_v57 = vld [vmem:[%s2208_s3 + $0x98] sm:$0xff]  ;;  %v1041_v59 = vld [vmem:[%s2208_s3 + $0x90] sm:$0xff]  ;;  %v1024_v62 = vld [vmem:[%s2208_s3 + $0x8] sm:$0xff] }
  0x22   : > { %1334 = vmatmul.mubr.msk.f32.gmra.mxu0 %vm289_vm1, %v1688_v17  ;;  %1352 = vmatmul.mubr.msk.f32.gmra.mxu1 %vm289_vm1, %v264_v11  ;;  %v1026_v58 = vld [vmem:[%s2208_s3 + $0x18] sm:$0xff]  ;;  %v1025_v60 = vld [vmem:[%s2208_s3 + $0x10] sm:$0xff]  ;;  %v1039_v63 = vld [vmem:[%s2208_s3 + $0x80] sm:$0xff] }
  0x23   : > { %427 = vmatprep.mubr.f32.mxu0 %v1554_v9  ;;  %600 = vmatprep.mubr.f32.mxu1 %v1554_v9  ;;  %v1023_v0 = vld [vmem:[%s2208_s3] sm:$0xff] }
  0x24   : > { %1395 = vmatprep.subr.mxu1 %v1052_v35 }
  0x25   : > { %1396 = vmatpush3.msra.mxu1 %v1036_v36 }
  0x26   : > { %1335 = vmatmul.mubr.msk.f32.gmra.mxu0 %vm289_vm1, %v1696_v18  ;;  %1353 = vmatmul.mubr.msk.f32.gmra.mxu1 %vm289_vm1, %v265_v15 }
  0x27   : > { %433 = vmatprep.mubr.f32.mxu0 %v1554_v9  ;;  %606 = vmatprep.mubr.f32.mxu1 %v1554_v9 }
  0x28   : > { %1397 = vmatprep.subr.mxu1 %v1051_v37 }
  0x29   : > { %1398 = vmatpush3.msra.mxu1 %v1035_v38 }
  0x2a   : > { %1336 = vmatmul.mubr.msk.f32.gmra.mxu0 %vm289_vm1, %v1704_v19  ;;  %1354 = vmatmul.mubr.msk.f32.gmra.mxu1 %vm289_vm1, %v1688_v17 }
  0x2b   : > { %439 = vmatprep.mubr.f32.mxu0 %v1554_v9  ;;  %612 = vmatprep.mubr.f32.mxu1 %v1554_v9 }
  0x2c   : > { %1399 = vmatprep.subr.mxu1 %v1050_v39 }
  0x2d   : > { %1400 = vmatpush3.msra.mxu1 %v1034_v40 }
  0x2e   : > { %1337 = vmatmul.mubr.msk.f32.gmra.mxu0 %vm289_vm1, %v1713_v20  ;;  %1355 = vmatmul.mubr.msk.f32.gmra.mxu1 %vm289_vm1, %v1696_v18 }
  0x2f   : > { %445 = vmatprep.mubr.f32.mxu0 %v1554_v9  ;;  %618 = vmatprep.mubr.f32.mxu1 %v1554_v9 }
  0x30   : > { %1401 = vmatprep.subr.mxu1 %v1049_v41 }
  0x31   : > { %1402 = vmatpush3.msra.mxu1 %v1033_v42  ;;  %v949_v42 = vlaneseq }
  0x32   : > { %1338 = vmatmul.mubr.msk.f32.gmra.mxu0 %vm289_vm1, %v1722_v21  ;;  %1356 = vmatmul.mubr.msk.f32.gmra.mxu1 %vm289_vm1, %v1704_v19 }
  0x33   : > { %451 = vmatprep.mubr.f32.mxu0 %v1554_v9  ;;  %624 = vmatprep.mubr.f32.mxu1 %v1554_v9 }
  0x34   : > { %1403 = vmatprep.subr.mxu1 %v1048_v43 }
  0x35   : > { %1404 = vmatpush3.msra.mxu1 %v1032_v44 }
  0x36   : > { %1339 = vmatmul.mubr.msk.f32.gmra.mxu0 %vm289_vm1, %v1731_v22  ;;  %1357 = vmatmul.mubr.msk.f32.gmra.mxu1 %vm289_vm1, %v1713_v20 }
  0x37   : > { %457 = vmatprep.mubr.f32.mxu0 %v1554_v9  ;;  %630 = vmatprep.mubr.f32.mxu1 %v1554_v9 }
  0x38   : > { %1405 = vmatprep.subr.mxu1 %v1047_v45 }
  0x39   : > { %1406 = vmatpush3.msra.mxu1 %v1031_v46  ;;  %v950_v46 = vshrl.u32 %v949_v42, 7 }
  0x3a   : > { %1340 = vmatmul.mubr.msk.f32.gmra.mxu0 %vm289_vm1, %v1740_v23  ;;  %1358 = vmatmul.mubr.msk.f32.gmra.mxu1 %vm289_vm1, %v1722_v21 }
  0x3b   : > { %463 = vmatprep.mubr.f32.mxu0 %v1554_v9  ;;  %636 = vmatprep.mubr.f32.mxu1 %v1554_v9 }
  0x3c   : > { %1407 = vmatprep.subr.mxu1 %v1046_v47 }
  0x3d   : > { %1408 = vmatpush3.msra.mxu1 %v1030_v48 }
  0x3e   : > { %1341 = vmatmul.mubr.msk.f32.gmra.mxu0 %vm289_vm1, %v1749_v24  ;;  %1359 = vmatmul.mubr.msk.f32.gmra.mxu1 %vm289_vm1, %v1731_v22 }
  0x3f   : > { %469 = vmatprep.mubr.f32.mxu0 %v1554_v9  ;;  %642 = vmatprep.mubr.f32.mxu1 %v1554_v9 }
  0x40   : > { %1409 = vmatprep.subr.mxu1 %v1045_v49 }
  0x41   : > { %1410 = vmatpush3.msra.mxu1 %v1029_v50  ;;  %v951_v50 = vsub.s32 0, %v950_v46 }
  0x42   : > { %1342 = vmatmul.mubr.msk.f32.gmra.mxu0 %vm289_vm1, %v1758_v25  ;;  %1360 = vmatmul.mubr.msk.f32.gmra.mxu1 %vm289_vm1, %v1740_v23 }
  0x43   : > { %475 = vmatprep.mubr.f32.mxu0 %v1554_v9  ;;  %648 = vmatprep.mubr.f32.mxu1 %v1554_v9 }
  0x44   : > { %1411 = vmatprep.subr.mxu1 %v1044_v51  ;;  %v947_v51 = vld [vmem:[%s2207_s2] sm:$0x3] }
  0x45   : > { %1412 = vmatpush3.msra.mxu1 %v1028_v52  ;;  %v955_v52 = vsub.s32 1, %v950_v46 }
  0x46   : > { %1343 = vmatmul.mubr.msk.f32.gmra.mxu0 %vm289_vm1, %v1767_v26  ;;  %1361 = vmatmul.mubr.msk.f32.gmra.mxu1 %vm289_vm1, %v1749_v24 }
  0x47   : > { %481 = vmatprep.mubr.f32.mxu0 %v1554_v9  ;;  %654 = vmatprep.mubr.f32.mxu1 %v1554_v9 }
  0x48   : > { %1413 = vmatprep.subr.mxu1 %v1043_v54 }
  0x49   : > { %1414 = vmatpush3.msra.mxu1 %v1027_v55 }
  0x4a   : > { %1344 = vmatmul.mubr.msk.f32.gmra.mxu0 %vm289_vm1, %v1776_v27  ;;  %1362 = vmatmul.mubr.msk.f32.gmra.mxu1 %vm289_vm1, %v1758_v25 }
  0x4b   : > { %487 = vmatprep.mubr.f32.mxu0 %v1554_v9  ;;  %660 = vmatprep.mubr.f32.mxu1 %v1554_v9 }
  0x4c   : > { %1415 = vmatprep.subr.mxu1 %v1042_v57  ;;  %v2036_v57 = vrot.slane %v947_v51, %v951_v50 }
  0x4d   : > { %1416 = vmatpush3.msra.mxu1 %v1026_v58 }
  0x4e   : > { %1345 = vmatmul.mubr.msk.f32.gmra.mxu0 %vm289_vm1, %v1785_v28  ;;  %1363 = vmatmul.mubr.msk.f32.gmra.mxu1 %vm289_vm1, %v1767_v26 }
  0x4f   : > { %493 = vmatprep.mubr.f32.mxu0 %v1554_v9  ;;  %666 = vmatprep.mubr.f32.mxu1 %v1554_v9 }
  0x50   : > { %1417 = vmatprep.subr.mxu1 %v1041_v59 }
  0x51   : > { %1418 = vmatpush3.msra.mxu1 %v1025_v60  ;;  %v2038_v60 = vrot.slane %v947_v51, %v955_v52 }
  0x52   : > { %1346 = vmatmul.mubr.msk.f32.gmra.mxu0 %vm289_vm1, %v1794_v29  ;;  %1364 = vmatmul.mubr.msk.f32.gmra.mxu1 %vm289_vm1, %v1776_v27 }
  0x53   : > { %499 = vmatprep.mubr.f32.mxu0 %v1554_v9  ;;  %672 = vmatprep.mubr.f32.mxu1 %v1554_v9 }
  0x54   : > { %1419 = vmatprep.subr.mxu1 %v1040_v61 }
  0x55   : > { %1420 = vmatpush3.msra.mxu1 %v1024_v62 }
  0x56   : > { %1347 = vmatmul.mubr.msk.f32.gmra.mxu0 %vm289_vm1, %v1803_v30  ;;  %1365 = vmatmul.mubr.msk.f32.gmra.mxu1 %vm289_vm1, %v1785_v28 }
  0x57   : > { %818 = vmatprep.mubr.f32.mxu0 %v1554_v9  ;;  %1421 = vmatprep.subr.mxu1 %v1039_v63 }
  0x58   : > { %1422 = vmatpush3.msra.mxu1 %v1023_v0 }
  0x5a   : > { %1372 = vmatmul.mubr.msk.f32.vlgmr.msra.gmra.mxu0 %vm289_vm1, %v1688_v17 }
  0x5b   : > { %824 = vmatprep.mubr.f32.mxu0 %v1554_v9 }
  0x5e   : > { %1373 = vmatmul.mubr.msk.f32.gmra.mxu0 %vm289_vm1, %v1696_v18 }
  0x5f   : > { %830 = vmatprep.mubr.f32.mxu0 %v1554_v9 }
  0x62   : > { %1374 = vmatmul.mubr.msk.f32.gmra.mxu0 %vm289_vm1, %v1704_v19 }
  0x63   : > { %836 = vmatprep.mubr.f32.mxu0 %v1554_v9 }
  0x66   : > { %1375 = vmatmul.mubr.msk.f32.gmra.mxu0 %vm289_vm1, %v1713_v20 }
  0x67   : > { %842 = vmatprep.mubr.f32.mxu0 %v1554_v9 }
  0x6a   : > { %1376 = vmatmul.mubr.msk.f32.gmra.mxu0 %vm289_vm1, %v1722_v21 }
  0x6b   : > { %848 = vmatprep.mubr.f32.mxu0 %v1554_v9 }
  0x6e   : > { %1377 = vmatmul.mubr.msk.f32.gmra.mxu0 %vm289_vm1, %v1731_v22 }
  0x6f   : > { %854 = vmatprep.mubr.f32.mxu0 %v1554_v9 }
  0x72   : > { %1378 = vmatmul.mubr.msk.f32.gmra.mxu0 %vm289_vm1, %v1740_v23 }
  0x73   : > { %860 = vmatprep.mubr.f32.mxu0 %v1554_v9 }
  0x76   : > { %1379 = vmatmul.mubr.msk.f32.gmra.mxu0 %vm289_vm1, %v1749_v24 }
  0x77   : > { %866 = vmatprep.mubr.f32.mxu0 %v1554_v9 }
  0x7a   : > { %1380 = vmatmul.mubr.msk.f32.gmra.mxu0 %vm289_vm1, %v1758_v25 }
  0x7b   : > { %872 = vmatprep.mubr.f32.mxu0 %v1554_v9 }
  0x7e   : > { %1381 = vmatmul.mubr.msk.f32.gmra.mxu0 %vm289_vm1, %v1767_v26 }
  0x7f   : > { %878 = vmatprep.mubr.f32.mxu0 %v1554_v9 }
  0x82   : > { %1382 = vmatmul.mubr.msk.f32.gmra.mxu0 %vm289_vm1, %v1776_v27 }
  0x83   : > { %884 = vmatprep.mubr.f32.mxu0 %v1554_v9 }
  0x86   : > { %1383 = vmatmul.mubr.msk.f32.gmra.mxu0 %vm289_vm1, %v1785_v28 }
  0x87   : > { %890 = vmatprep.mubr.f32.mxu0 %v1554_v9 }
  0x8a   : > { %1384 = vmatmul.mubr.msk.f32.gmra.mxu0 %vm289_vm1, %v1794_v29 }
  0x8b   : > { %896 = vmatprep.mubr.f32.mxu0 %v1554_v9 }
  0x8e   : > { %1385 = vmatmul.mubr.msk.f32.gmra.mxu0 %vm289_vm1, %v1803_v30 }
  0x8f   : > { %902 = vmatprep.mubr.f32.mxu0 %v1554_v9 }
  0x92   : > { %1386 = vmatmul.mubr.msk.f32.gmra.mxu0 %vm289_vm1, %v693_v53 }
  0x93   : > { %908 = vmatprep.mubr.f32.mxu0 %v1554_v9 }
  0x96   : > { %1387 = vmatmul.mubr.msk.f32.gmra.mxu0 %vm289_vm1, %v694_v56 }
  0xda   : > { %v411_v1 = vpop.f32.mrf.mxu0  ;;  %v584_v2 = vpop.f32.mrf.mxu1 }
  0xdb   : > { %v585_v55 = vadd.f32 %v584_v2, %v411_v1 }
  0xdc   : > { %v413_v3 = vpop.f32.mrf.mxu0  ;;  %v586_v4 = vpop.f32.mrf.mxu1 }
  0xdd   : > { %v587_v58 = vadd.f32 %v586_v4, %v413_v3 }
  0xde   : > { %v417_v5 = vpop.f32.mrf.mxu0  ;;  %v590_v6 = vpop.f32.mrf.mxu1 }
  0xdf   : > { %v591_v63 = vadd.f32 %v590_v6, %v417_v5 }
  0xe0   : > { %v419_v7 = vpop.f32.mrf.mxu0  ;;  %v592_v9 = vpop.f32.mrf.mxu1 }
  0xe2   : > { %v1953_v8 = vpop.f32.mrf.mxu0  ;;  %v596_v12 = vpop.f32.mrf.mxu1 }
  0xe3   : > { %v597_v3 = vadd.f32 %v596_v12, %v1953_v8 }
  0xe4   : > { %v1955_v10 = vpop.f32.mrf.mxu0  ;;  %v1963_v15 = vpop.f32.mrf.mxu1 }
  0xe5   : > { %v599_v5 = vadd.f32 %v1963_v15, %v1955_v10 }
  0xe6   : > { %v1957_v11 = vpop.f32.mrf.mxu0  ;;  %v1969_v18 = vpop.f32.mrf.mxu1 }
  0xe7   : > { %v603_v8 = vadd.f32 %v1969_v18, %v1957_v11 }
  0xe8   : > { %v1959_v13 = vpop.f32.mrf.mxu0  ;;  %v1975_v21 = vpop.f32.mrf.mxu1 }
  0xe9   : > { %v605_v10 = vadd.f32 %v1975_v21, %v1959_v13 }
  0xea   : > { %v1961_v14 = vpop.f32.mrf.mxu0  ;;  %v1981_v24 = vpop.f32.mrf.mxu1 }
  0xeb   : > { %v609_v11 = vadd.f32 %v1981_v24, %v1961_v14 }
  0xec   : > { %v1965_v16 = vpop.f32.mrf.mxu0  ;;  %v1987_v27 = vpop.f32.mrf.mxu1 }
  0xed   : > { %v611_v13 = vadd.f32 %v1987_v27, %v1965_v16 }
  0xee   : > { %v1967_v17 = vpop.f32.mrf.mxu0  ;;  %v1993_v30 = vpop.f32.mrf.mxu1 }
  0xef   : > { %v615_v14 = vadd.f32 %v1993_v30, %v1967_v17 }
  0xf0   : > { %v1971_v19 = vpop.f32.mrf.mxu0  ;;  %v1999_v33 = vpop.f32.mrf.mxu1 }
  0xf1   : > { %v617_v16 = vadd.f32 %v1999_v33, %v1971_v19 }
  0xf2   : > { %v1973_v20 = vpop.f32.mrf.mxu0  ;;  %v2005_v36 = vpop.f32.mrf.mxu1 }
  0xf3   : > { %v621_v17 = vadd.f32 %v2005_v36, %v1973_v20 }
  0xf4   : > { %v1977_v22 = vpop.f32.mrf.mxu0  ;;  %v2011_v39 = vpop.f32.mrf.mxu1 }
  0xf5   : > { %v623_v19 = vadd.f32 %v2011_v39, %v1977_v22 }
  0xf6   : > { %v1979_v23 = vpop.f32.mrf.mxu0  ;;  %v2017_v43 = vpop.f32.mrf.mxu1 }
  0xf8   : > { %v1983_v25 = vpop.f32.mrf.mxu0  ;;  %v2023_v47 = vpop.f32.mrf.mxu1 }
  0xfa   : > { %v1985_v26 = vpop.f32.mrf.mxu0  ;;  %v2032_v53 = vpop.f32.mrf.mxu1 }
  0xfc   : > { %v1989_v28 = vpop.f32.mrf.mxu0  ;;  %v2040_v61 = vpop.f32.mrf.mxu1 }
  0xfe   : > { %v1991_v29 = vpop.f32.mrf.mxu0  ;;  %v2044_v1 = vpop.f32.mrf.mxu1 }
 0x100   : > { %v1995_v31 = vpop.f32.mrf.mxu0 }
 0x102   : > { %v1997_v32 = vpop.f32.mrf.mxu0 }
 0x104   : > { %v2001_v34 = vpop.f32.mrf.mxu0 }
 0x106   : > { %v2003_v35 = vpop.f32.mrf.mxu0 }
 0x108   : > { %v2007_v37 = vpop.f32.mrf.mxu0 }
 0x10a   : > { %v2009_v38 = vpop.f32.mrf.mxu0 }
 0x10c   : > { %v2013_v40 = vpop.f32.mrf.mxu0 }
 0x10e   : > { %v2015_v41 = vpop.f32.mrf.mxu0 }
 0x110   : > { %v2019_v44 = vpop.f32.mrf.mxu0 }
 0x112   : > { %v2021_v45 = vpop.f32.mrf.mxu0 }
 0x114   : > { %v2025_v48 = vpop.f32.mrf.mxu0 }
 0x115   : > { %2211 = vst [vmem:[#allocation2_spill] sm:$0xff] %v2025_v48 }
 0x116   : > { %v2027_v49 = vpop.f32.mrf.mxu0 }
 0x117   : > { %2212 = vst [vmem:[#allocation3_spill] sm:$0xff] %v2027_v49  ;;  %v593_v49 = vadd.f32 %v592_v9, %v419_v7  ;;  %v2051_v9 = vpop.f32.mrf.mxu1 }
 0x118   : > { %v2034_v54 = vpop.f32.mrf.mxu0 }
 0x119   : > { %2213 = vst [vmem:[#allocation4_spill] sm:$0xff] %v2034_v54 }
 0x11a   : > { %v820_v56 = vpop.f32.mrf.mxu0 }
 0x11b   : > { %v915_v59 = vadd.f32 %v820_v56, %v585_v55 }
 0x11c   : > { %v822_v62 = vpop.f32.mrf.mxu0 }
 0x11d   : > { %v916_v0 = vadd.f32 %v822_v62, %v587_v58  ;;  %v959_v42 = vadd.f32 %v2036_v57, %v915_v59  ;;  %v2059_v62 = vpop.f32.mrf.mxu1 }
 0x11e   : > { %v826_v46 = vpop.f32.mrf.mxu0 }
 0x11f   : > { %v960_v48 = vadd.f32 %v2038_v60, %v916_v0  ;;  %v917_v54 = vadd.f32 %v826_v46, %v591_v63  ;;  %v991_v51 = vmax.f32 %v959_v42, 0.0 }
 0x120   : > { %v828_v2 = vpop.f32.mrf.mxu0 }
 0x121   : > { %v992_v4 = vmax.f32 %v960_v48, 0.0  ;;  %v918_v50 = vadd.f32 %v828_v2, %v593_v49  ;;  %v961_v52 = vadd.f32 %v2036_v57, %v917_v54 }
 0x122   : > { %v832_v55 = vpop.f32.mrf.mxu0 }
 0x123   : > { %v962_v6 = vadd.f32 %v2038_v60, %v918_v50  ;;  %v919_v7 = vadd.f32 %v832_v55, %v597_v3  ;;  %1126 = vmatprep.mubr.f32.mxu1 %v992_v4  ;;  %v993_v49 = vmax.f32 %v961_v52, 0.0  ;;  %v2067_v4 = vpop.f32.mrf.mxu1 }
 0x124   : > { %v834_v56 = vpop.f32.mrf.mxu0  ;;  %1127 = vmatmul.mubr.f32.vlgmr.msra.gmra.mxu1 %v991_v51 }
 0x125   : > { %v994_v12 = vmax.f32 %v962_v6, 0.0  ;;  %v920_v48 = vadd.f32 %v834_v56, %v599_v5  ;;  %v963_v54 = vadd.f32 %v2036_v57, %v919_v7  ;;  %v2075_v7 = vpop.f32.mrf.mxu1 }
 0x126   : > { %v838_v58 = vpop.f32.mrf.mxu0 }
 0x127   : > { %v964_v15 = vadd.f32 %v2038_v60, %v920_v48  ;;  %v921_v59 = vadd.f32 %v838_v58, %v603_v8  ;;  %1131 = vmatprep.mubr.f32.mxu1 %v994_v12  ;;  %v995_v42 = vmax.f32 %v963_v54, 0.0  ;;  %v652_v58 = vpop.f32.mrf.mxu1 }
 0x128   : > { %v840_v63 = vpop.f32.mrf.mxu0  ;;  %1132 = vmatmul.mubr.f32.gmra.mxu1 %v993_v49 }
 0x129   : > { %v996_v18 = vmax.f32 %v964_v15, 0.0  ;;  %v922_v0 = vadd.f32 %v840_v63, %v605_v10  ;;  %v965_v46 = vadd.f32 %v2036_v57, %v921_v59  ;;  %v627_v15 = vadd.f32 %v2017_v43, %v1979_v23 }
 0x12a   : > { %v844_v2 = vpop.f32.mrf.mxu0 }
 0x12b   : > { %v966_v21 = vadd.f32 %v2038_v60, %v922_v0  ;;  %v923_v3 = vadd.f32 %v844_v2, %v609_v11  ;;  %1136 = vmatprep.mubr.f32.mxu1 %v996_v18  ;;  %v997_v52 = vmax.f32 %v965_v46, 0.0  ;;  %v629_v18 = vadd.f32 %v2023_v47, %v1983_v25  ;;  %v656_v0 = vpop.f32.mrf.mxu1 }
 0x12c   : > { %v846_v50 = vpop.f32.mrf.mxu0  ;;  %1137 = vmatmul.mubr.f32.gmra.mxu1 %v995_v42  ;;  %v633_v46 = vadd.f32 %v2032_v53, %v1985_v26 }
 0x12d   : > { %v998_v24 = vmax.f32 %v966_v21, 0.0  ;;  %v924_v51 = vadd.f32 %v846_v50, %v611_v13  ;;  %v967_v55 = vadd.f32 %v2036_v57, %v923_v3  ;;  %v635_v3 = vadd.f32 %v2040_v61, %v1989_v28  ;;  %v658_v50 = vpop.f32.mrf.mxu1 }
 0x12e   : > { %v850_v5 = vpop.f32.mrf.mxu0 }
 0x12f   : > { %v968_v27 = vadd.f32 %v2038_v60, %v924_v51  ;;  %v925_v6 = vadd.f32 %v850_v5, %v615_v14  ;;  %1141 = vmatprep.mubr.f32.mxu1 %v998_v24  ;;  %v999_v12 = vmax.f32 %v967_v55, 0.0  ;;  %v639_v24 = vadd.f32 %v2044_v1, %v1991_v29 }
 0x130   : > { %v852_v56 = vpop.f32.mrf.mxu0  ;;  %1142 = vmatmul.mubr.f32.gmra.mxu1 %v997_v52  ;;  %v641_v5 = vadd.f32 %v2051_v9, %v1995_v31 }
 0x131   : > { %v1000_v30 = vmax.f32 %v968_v27, 0.0  ;;  %v926_v8 = vadd.f32 %v852_v56, %v617_v16  ;;  %v969_v48 = vadd.f32 %v2036_v57, %v925_v6  ;;  %v662_v16 = vpop.f32.mrf.mxu1  ;;  %v645_v6 = vadd.f32 %v2059_v62, %v1997_v32 }
 0x132   : > { %v856_v49 = vpop.f32.mrf.mxu0 }
 0x133   : > { %v970_v33 = vadd.f32 %v2038_v60, %v926_v8  ;;  %v927_v54 = vadd.f32 %v856_v49, %v621_v17  ;;  %1146 = vmatprep.mubr.f32.mxu1 %v1000_v30  ;;  %v1001_v59 = vmax.f32 %v969_v48, 0.0  ;;  %v647_v8 = vadd.f32 %v2067_v4, %v2001_v34 }
 0x134   : > { %v858_v10 = vpop.f32.mrf.mxu0  ;;  %1147 = vmatmul.mubr.f32.gmra.mxu1 %v999_v12  ;;  %v664_v12 = vpop.f32.mrf.mxu1  ;;  %v651_v49 = vadd.f32 %v2075_v7, %v2003_v35 }
 0x135   : > { %v1002_v20 = vmax.f32 %v970_v33, 0.0  ;;  %v928_v36 = vadd.f32 %v858_v10, %v623_v19  ;;  %v971_v63 = vadd.f32 %v2036_v57, %v927_v54  ;;  %v653_v10 = vadd.f32 %v652_v58, %v2007_v37 }
 0x136   : > { %v862_v11 = vpop.f32.mrf.mxu0 }
 0x137   : > { %v972_v22 = vadd.f32 %v2038_v60, %v928_v36  ;;  %v929_v39 = vadd.f32 %v862_v11, %v627_v15  ;;  %1151 = vmatprep.mubr.f32.mxu1 %v1002_v20  ;;  %v1003_v2 = vmax.f32 %v971_v63, 0.0  ;;  %v668_v15 = vpop.f32.mrf.mxu1  ;;  %v657_v36 = vadd.f32 %v656_v0, %v2009_v38 }
 0x138   : > { %v864_v42 = vpop.f32.mrf.mxu0  ;;  %1152 = vmatmul.mubr.f32.gmra.mxu1 %v1001_v59 }
 0x139   : > { %v1004_v23 = vmax.f32 %v972_v22, 0.0  ;;  %v930_v43 = vadd.f32 %v864_v42, %v629_v18  ;;  %v973_v13 = vadd.f32 %v2036_v57, %v929_v39  ;;  %v659_v18 = vadd.f32 %v658_v50, %v2013_v40  ;;  %v670_v58 = vpop.f32.mrf.mxu1 }
 0x13a   : > { %v868_v21 = vpop.f32.mrf.mxu0  ;;  %v663_v42 = vadd.f32 %v662_v16, %v2015_v41 }
 0x13b   : > { %v974_v25 = vadd.f32 %v2038_v60, %v930_v43  ;;  %v931_v47 = vadd.f32 %v868_v21, %v633_v46  ;;  %1156 = vmatprep.mubr.f32.mxu1 %v1004_v23  ;;  %v1005_v51 = vmax.f32 %v973_v13, 0.0  ;;  %v674_v21 = vpop.f32.mrf.mxu1 }
 0x13c   : > { %v870_v14 = vpop.f32.mrf.mxu0  ;;  %1157 = vmatmul.mubr.f32.gmra.mxu1 %v1003_v2  ;;  %v665_v2 = vadd.f32 %v664_v12, %v2019_v44 }
 0x13d   : > { %v1006_v26 = vmax.f32 %v974_v25, 0.0  ;;  %v932_v53 = vadd.f32 %v870_v14, %v635_v3  ;;  %v975_v52 = vadd.f32 %v2036_v57, %v931_v47  ;;  %v669_v25 = vadd.f32 %v668_v15, %v2021_v45 }
 0x13e   : > { %v874_v55 = vpop.f32.mrf.mxu0 }
 0x13f   : > { %v976_v28 = vadd.f32 %v2038_v60, %v932_v53  ;;  %v933_v61 = vadd.f32 %v874_v55, %v639_v24  ;;  %1161 = vmatprep.mubr.f32.mxu1 %v1006_v26  ;;  %v1007_v56 = vmax.f32 %v975_v52, 0.0  ;;  %v2214_v26 = vld [vmem:[#allocation2_spill] sm:$0xff]  ;;  %v676_v52 = vpop.f32.mrf.mxu1 }
 0x140   : > { %v876_v27 = vpop.f32.mrf.mxu0  ;;  %1162 = vmatmul.mubr.f32.gmra.mxu1 %v1005_v51  ;;  %v671_v53 = vadd.f32 %v670_v58, %v2214_v26 }
 0x141   : > { %v1008_v29 = vmax.f32 %v976_v28, 0.0  ;;  %v934_v1 = vadd.f32 %v876_v27, %v641_v5  ;;  %v977_v17 = vadd.f32 %v2036_v57, %v933_v61  ;;  %v2215_v5 = vld [vmem:[#allocation3_spill] sm:$0xff] }
 0x142   : > { %v880_v30 = vpop.f32.mrf.mxu0  ;;  %v675_v28 = vadd.f32 %v674_v21, %v2215_v5 }
 0x143   : > { %v978_v31 = vadd.f32 %v2038_v60, %v934_v1  ;;  %v935_v9 = vadd.f32 %v880_v30, %v645_v6  ;;  %1166 = vmatprep.mubr.f32.mxu1 %v1008_v29  ;;  %v1009_v19 = vmax.f32 %v977_v17, 0.0  ;;  %v2216_v29 = vld [vmem:[#allocation4_spill] sm:$0xff] }
 0x144   : > { %v882_v48 = vpop.f32.mrf.mxu0  ;;  %1167 = vmatmul.mubr.f32.gmra.mxu1 %v1007_v56  ;;  %v677_v1 = vadd.f32 %v676_v52, %v2216_v29 }
 0x145   : > { %v1010_v32 = vmax.f32 %v978_v31, 0.0  ;;  %v936_v62 = vadd.f32 %v882_v48, %v647_v8  ;;  %v979_v33 = vadd.f32 %v2036_v57, %v935_v9 }
 0x146   : > { %v886_v54 = vpop.f32.mrf.mxu0 }
 0x147   : > { %v980_v34 = vadd.f32 %v2038_v60, %v936_v62  ;;  %v937_v4 = vadd.f32 %v886_v54, %v651_v49  ;;  %1171 = vmatprep.mubr.f32.mxu1 %v1010_v32  ;;  %v1011_v35 = vmax.f32 %v979_v33, 0.0 }
 0x148   : > { %v888_v20 = vpop.f32.mrf.mxu0  ;;  %1172 = vmatmul.mubr.f32.gmra.mxu1 %v1009_v19  ;;  %v2135_v19 = vld [vmem:[%s2209_s4] ss:$0 sm:$0xff] }
 0x149   : > { %v1012_v59 = vmax.f32 %v980_v34, 0.0  ;;  %v938_v63 = vadd.f32 %v888_v20, %v653_v10  ;;  %v981_v7 = vadd.f32 %v2036_v57, %v937_v4 }
 0x14a   : > { %v892_v11 = vpop.f32.mrf.mxu0 }
 0x14b   : > { %v982_v22 = vadd.f32 %v2038_v60, %v938_v63  ;;  %v939_v37 = vadd.f32 %v892_v11, %v657_v36  ;;  %1176 = vmatprep.mubr.f32.mxu1 %v1012_v59  ;;  %v1013_v38 = vmax.f32 %v981_v7, 0.0 }
 0x14c   : > { %v894_v39 = vpop.f32.mrf.mxu0  ;;  %1177 = vmatmul.mubr.f32.gmra.mxu1 %v1011_v35 }
 0x14d   : > { %v1014_v46 = vmax.f32 %v982_v22, 0.0  ;;  %v940_v23 = vadd.f32 %v894_v39, %v659_v18  ;;  %v983_v0 = vadd.f32 %v2036_v57, %v939_v37 }
 0x14e   : > { %v898_v43 = vpop.f32.mrf.mxu0 }
 0x14f   : > { %v984_v13 = vadd.f32 %v2038_v60, %v940_v23  ;;  %v941_v40 = vadd.f32 %v898_v43, %v663_v42  ;;  %1181 = vmatprep.mubr.f32.mxu1 %v1014_v46  ;;  %v1015_v41 = vmax.f32 %v983_v0, 0.0 }
 0x150   : > { %v900_v3 = vpop.f32.mrf.mxu0  ;;  %1182 = vmatmul.mubr.f32.gmra.mxu1 %v1013_v38 }
 0x151   : > { %v1016_v47 = vmax.f32 %v984_v13, 0.0  ;;  %v942_v50 = vadd.f32 %v900_v3, %v665_v2  ;;  %v985_v14 = vadd.f32 %v2036_v57, %v941_v40 }
 0x152   : > { %v904_v24 = vpop.f32.mrf.mxu0 }
 0x153   : > { %v986_v51 = vadd.f32 %v2038_v60, %v942_v50  ;;  %v943_v44 = vadd.f32 %v904_v24, %v669_v25  ;;  %1186 = vmatprep.mubr.f32.mxu1 %v1016_v47  ;;  %v1017_v45 = vmax.f32 %v985_v14, 0.0 }
 0x154   : > { %v906_v55 = vpop.f32.mrf.mxu0  ;;  %1187 = vmatmul.mubr.f32.gmra.mxu1 %v1015_v41 }
 0x155   : > { %v1018_v61 = vmax.f32 %v986_v51, 0.0  ;;  %v944_v16 = vadd.f32 %v906_v55, %v671_v53  ;;  %v987_v27 = vadd.f32 %v2036_v57, %v943_v44 }
 0x156   : > { %v910_v6 = vpop.f32.mrf.mxu0 }
 0x157   : > { %v988_v56 = vadd.f32 %v2038_v60, %v944_v16  ;;  %v945_v17 = vadd.f32 %v910_v6, %v675_v28  ;;  %1191 = vmatprep.mubr.f32.mxu1 %v1018_v61  ;;  %v1019_v9 = vmax.f32 %v987_v27, 0.0 }
 0x158   : > { %v912_v30 = vpop.f32.mrf.mxu0  ;;  %1192 = vmatmul.mubr.f32.gmra.mxu1 %v1017_v45 }
 0x159   : > { %v1020_v8 = vmax.f32 %v988_v56, 0.0  ;;  %v946_v31 = vadd.f32 %v912_v30, %v677_v1  ;;  %v989_v12 = vadd.f32 %v2036_v57, %v945_v17 }
 0x15b   : > { %v990_v48 = vadd.f32 %v2038_v60, %v946_v31  ;;  %1196 = vmatprep.mubr.f32.mxu1 %v1020_v8  ;;  %v1021_v32 = vmax.f32 %v989_v12, 0.0 }
 0x15c   : > { %1197 = vmatmul.mubr.f32.gmra.mxu1 %v1019_v9 }
 0x15d   : > { %v1022_v49 = vmax.f32 %v990_v48, 0.0 }
 0x15f   : > { %1201 = vmatprep.mubr.f32.mxu1 %v1022_v49 }
 0x160   : > { %1202 = vmatmul.mubr.f32.gmra.mxu1 %v1021_v32 }
 0x1e4   : > { %v1423_v62 = vpop.f32.mrf.mxu1 }
 0x1e6   : > { %v1424_v57 = vpop.f32.mrf.mxu1 }
 0x1e7   : > { %v1425_v60 = vadd.f32 %v1424_v57, %v1423_v62 }
 0x1e8   : > { %v1426_v33 = vpop.f32.mrf.mxu1 }
 0x1e9   : > { %v1129_v54 = vadd.f32 %v1425_v60, %v2135_v19 }
 0x1ea   : > { %v1427_v10 = vpop.f32.mrf.mxu1 }
 0x1eb   : > { %1208 = vst.msk [vmem:[%s2140_s7] sm:$0xff] %vm1207_vm2, %v1129_v54  ;;  %v1428_v34 = vadd.f32 %v1427_v10, %v1426_v33 }
 0x1ec   : > { %v1429_v4 = vpop.f32.mrf.mxu1 }
 0x1ed   : > { %v1134_v15 = vadd.f32 %v1428_v34, %v2135_v19 }
 0x1ee   : > { %v1430_v20 = vpop.f32.mrf.mxu1 }
 0x1ef   : > { %1209 = vst.msk [vmem:[%s2140_s7 + $0x8] sm:$0xff] %vm1207_vm2, %v1134_v15  ;;  %v1431_v36 = vadd.f32 %v1430_v20, %v1429_v4 }
 0x1f0   : > { %v1432_v59 = vpop.f32.mrf.mxu1 }
 0x1f1   : > { %v1139_v63 = vadd.f32 %v1431_v36, %v2135_v19 }
 0x1f2   : > { %v1433_v35 = vpop.f32.mrf.mxu1 }
 0x1f3   : > { %1210 = vst.msk [vmem:[%s2140_s7 + $0x10] sm:$0xff] %vm1207_vm2, %v1139_v63  ;;  %v1434_v7 = vadd.f32 %v1433_v35, %v1432_v59 }
 0x1f4   : > { %v1435_v11 = vpop.f32.mrf.mxu1 }
 0x1f5   : > { %v1144_v18 = vadd.f32 %v1434_v7, %v2135_v19 }
 0x1f6   : > { %v1436_v22 = vpop.f32.mrf.mxu1 }
 0x1f7   : > { %1211 = vst.msk [vmem:[%s2140_s7 + $0x18] sm:$0xff] %vm1207_vm2, %v1144_v18  ;;  %v1437_v37 = vadd.f32 %v1436_v22, %v1435_v11 }
 0x1f8   : > { %v1438_v58 = vpop.f32.mrf.mxu1 }
 0x1f9   : > { %v1149_v39 = vadd.f32 %v1437_v37, %v2135_v19 }
 0x1fa   : > { %v1439_v42 = vpop.f32.mrf.mxu1 }
 0x1fb   : > { %1212 = vst.msk [vmem:[%s2140_s7 + $0x20] sm:$0xff] %vm1207_vm2, %v1149_v39  ;;  %v1440_v46 = vadd.f32 %v1439_v42, %v1438_v58 }
 0x1fc   : > { %v1441_v23 = vpop.f32.mrf.mxu1 }
 0x1fd   : > { %v1154_v38 = vadd.f32 %v1440_v46, %v2135_v19 }
 0x1fe   : > { %v1442_v0 = vpop.f32.mrf.mxu1 }
 0x1ff   : > { %1213 = vst.msk [vmem:[%s2140_s7 + $0x28] sm:$0xff] %vm1207_vm2, %v1154_v38  ;;  %v1443_v43 = vadd.f32 %v1442_v0, %v1441_v23 }
 0x200   : > { %v1444_v2 = vpop.f32.mrf.mxu1 }
 0x201   : > { %v1159_v13 = vadd.f32 %v1443_v43, %v2135_v19 }
 0x202   : > { %v1445_v40 = vpop.f32.mrf.mxu1 }
 0x203   : > { %1214 = vst.msk [vmem:[%s2140_s7 + $0x30] sm:$0xff] %vm1207_vm2, %v1159_v13  ;;  %v1446_v21 = vadd.f32 %v1445_v40, %v1444_v2 }
 0x204   : > { %v1447_v3 = vpop.f32.mrf.mxu1 }
 0x205   : > { %v1164_v25 = vadd.f32 %v1446_v21, %v2135_v19 }
 0x206   : > { %v1448_v47 = vpop.f32.mrf.mxu1 }
 0x207   : > { %1215 = vst.msk [vmem:[%s2140_s7 + $0x38] sm:$0xff] %vm1207_vm2, %v1164_v25  ;;  %v1449_v50 = vadd.f32 %v1448_v47, %v1447_v3 }
 0x208   : > { %v1450_v41 = vpop.f32.mrf.mxu1 }
 0x209   : > { %v1169_v14 = vadd.f32 %v1449_v50, %v2135_v19 }
 0x20a   : > { %v1451_v24 = vpop.f32.mrf.mxu1 }
 0x20b   : > { %1216 = vst.msk [vmem:[%s2140_s7 + $0x40] sm:$0xff] %vm1207_vm2, %v1169_v14  ;;  %v1452_v26 = vadd.f32 %v1451_v24, %v1450_v41 }
 0x20c   : > { %v1453_v53 = vpop.f32.mrf.mxu1 }
 0x20d   : > { %v1174_v51 = vadd.f32 %v1452_v26, %v2135_v19 }
 0x20e   : > { %v1454_v44 = vpop.f32.mrf.mxu1 }
 0x20f   : > { %1217 = vst.msk [vmem:[%s2140_s7 + $0x48] sm:$0xff] %vm1207_vm2, %v1174_v51  ;;  %v1455_v52 = vadd.f32 %v1454_v44, %v1453_v53 }
 0x210   : > { %v1456_v55 = vpop.f32.mrf.mxu1 }
 0x211   : > { %v1179_v5 = vadd.f32 %v1455_v52, %v2135_v19 }
 0x212   : > { %v1457_v28 = vpop.f32.mrf.mxu1 }
 0x213   : > { %1218 = vst.msk [vmem:[%s2140_s7 + $0x50] sm:$0xff] %vm1207_vm2, %v1179_v5  ;;  %v1458_v61 = vadd.f32 %v1457_v28, %v1456_v55 }
 0x214   : > { %v1459_v16 = vpop.f32.mrf.mxu1 }
 0x215   : > { %v1184_v45 = vadd.f32 %v1458_v61, %v2135_v19 }
 0x216   : > { %v1460_v27 = vpop.f32.mrf.mxu1 }
 0x217   : > { %1219 = vst.msk [vmem:[%s2140_s7 + $0x58] sm:$0xff] %vm1207_vm2, %v1184_v45  ;;  %v1461_v6 = vadd.f32 %v1460_v27, %v1459_v16 }
 0x218   : > { %v1462_v29 = vpop.f32.mrf.mxu1 }
 0x219   : > { %v1189_v1 = vadd.f32 %v1461_v6, %v2135_v19 }
 0x21a   : > { %v1463_v56 = vpop.f32.mrf.mxu1 }
 0x21b   : > { %1220 = vst.msk [vmem:[%s2140_s7 + $0x60] sm:$0xff] %vm1207_vm2, %v1189_v1  ;;  %v1464_v17 = vadd.f32 %v1463_v56, %v1462_v29 }
 0x21c   : > { %v1465_v30 = vpop.f32.mrf.mxu1 }
 0x21d   : > { %v1194_v8 = vadd.f32 %v1464_v17, %v2135_v19 }
 0x21e   : > { %v1466_v31 = vpop.f32.mrf.mxu1 }
 0x21f   : > { %1221 = vst.msk [vmem:[%s2140_s7 + $0x68] sm:$0xff] %vm1207_vm2, %v1194_v8  ;;  %v1467_v9 = vadd.f32 %v1466_v31, %v1465_v30 }
 0x220   : > { %v1468_v12 = vpop.f32.mrf.mxu1 }
 0x221   : > { %v1199_v48 = vadd.f32 %v1467_v9, %v2135_v19 }
 0x222   : > { %v1469_v49 = vpop.f32.mrf.mxu1 }
 0x223   : > { %1222 = vst.msk [vmem:[%s2140_s7 + $0x70] sm:$0xff] %vm1207_vm2, %v1199_v48  ;;  %v1470_v32 = vadd.f32 %v1469_v49, %v1468_v12 }
 0x225   : > { %v1204_v62 = vadd.f32 %v1470_v32, %v2135_v19 }
 0x227   : > { %1223 = vst.msk [vmem:[%s2140_s7 + $0x78] sm:$0xff] %vm1207_vm2, %v1204_v62 }
 0x228 PF: > { %s15_s22 = sadd.s32 1, %s1552_s22   ;;  %s2217_s18 = smov %s1544_s20 }
 0x229   : > { %p12_p8 = scmp.ge.s32.totalorder %s15_s22, 6   ;;  %s2218_s19 = smov %s1548_s21 }
 0x22a   : > { %s2219_s20 = smov %s2222_s23  ;;  %s2220_s21 = smov %s2226_s24 }
 0x22b   :  { %14 = sbr.rel (!%p12_p8) target bundleno = 3 (0x3), region = 72 }

</bundles_post_ra>
